<compile_context>
chip_gen: v7x
topology: tpu7x:2x2x1
jax: 0.10.0
libtpu: 0.0.40
codegen_flags: <defaults>
</compile_context>

<pallas_src>
from functools import partial

import jax
import jax.numpy as jnp
from jax.experimental import pallas as pl
from jax.experimental.pallas import tpu as pltpu

LANE = 128                     # vreg lane width
MAX_TILE_ROWS = 8192           # 8192*128*4B = 4 MiB per f32 input block
_VMEM_LIMIT_BYTES = 40 * 1024 * 1024   # > 2 inputs * 2 bufs * 4 MiB, < 64 MiB
_SMALL_N_FALLBACK = 65536      # below this, fused XLA beats a kernel launch


def _round_up(x, m):
    return ((x + m - 1) // m) * m


def _round_down(x, m):
    return (x // m) * m


def _default_num_slices():
    # Only v7x has 2 TensorCores per chip; on v5e/v6e the slice axis is pure
    # overhead because the grid is a serial loop on one core.
    try:
        kind = jax.devices()[0].device_kind.lower()
    except Exception:
        return 1
    return 2 if ("v7" in kind or "tpu7" in kind) else 1


def _multiple_loss_kernel(p_ref, t_ref, out_ref, *, steps_per_slice,
                          tile_rows, rows_total, needs_mask):
    """Accumulate per-lane partial sums of (p-t)^2 and |p-t| into out_ref.

    p_ref, t_ref : (tile_rows, LANE) VMEM input tiles
    out_ref      : (1, 2, 8, LANE) per-slice partial sums, [0]=SSE, [1]=SAE.
                   Its block index is constant along grid axis 1, so it stays
                   VMEM-resident and acts as the accumulator.
    """
    s = pl.program_id(0)
    i = pl.program_id(1)

    @pl.when(i == 0)
    def _init():
        out_ref[...] = jnp.zeros_like(out_ref)

    d = p_ref[...].astype(jnp.float32) - t_ref[...].astype(jnp.float32)
    sq = d * d
    ab = jnp.abs(d)

    if needs_mask:
        # Mask rows past the real array extent (partial / clamped edge blocks).
        row0 = (s * steps_per_slice + i) * tile_rows
        rid = row0 + jax.lax.broadcasted_iota(jnp.int32, (tile_rows, LANE), 0)
        valid = rid < rows_total
        sq = jnp.where(valid, sq, 0.0)
        ab = jnp.where(valid, ab, 0.0)

    # Reduce only down to an (8, 128) vreg-shaped partial: pure VPU adds.
    sq3 = sq.reshape(tile_rows // 8, 8, LANE)
    ab3 = ab.reshape(tile_rows // 8, 8, LANE)
    out_ref[0, 0, :, :] += jnp.sum(sq3, axis=0)
    out_ref[0, 1, :, :] += jnp.sum(ab3, axis=0)


def _jnp_loss(predict, target, w_mse, w_mae):
    d = predict.astype(jnp.float32) - target.astype(jnp.float32)
    return w_mse * jnp.mean(d * d) + w_mae * jnp.mean(jnp.abs(d))


def multiple_loss(predict, target, weights=None, *,
                  min_pallas_elems=_SMALL_N_FALLBACK):
    """Pallas equivalent of MultipleLoss([MSELoss(), L1Loss()], weight=weights).

    predict, target: same shape/dtype (e.g. NCHW), f32 or bf16. Returns f32
    scalar.
    """
    assert predict.shape == target.shape
    if weights is None:
        weights = (0.5, 0.5)            # [1/len(losses)] * len(losses)
    w_mse = float(weights[0])
    w_mae = float(weights[1])

    n = predict.size
    itemsize = jnp.dtype(predict.dtype).itemsize
    row_align = 8 * max(1, 4 // itemsize)    # 8 f32 / 16 bf16 / 32 int8
    rows = n // LANE

    # Fallback: lane-ragged or tiny inputs -> single fused XLA pass.
    if (n % LANE != 0) or (n < min_pallas_elems) or (rows < row_align):
        return _jnp_loss(predict, target, w_mse, w_mae)

    num_slices = _default_num_slices()

    # --- static tiling (all Python ints) -------------------------------------
    tile_rows = min(MAX_TILE_ROWS,
                    _round_up(pl.cdiv(rows, num_slices), row_align),
                    _round_down(rows, row_align))
    total_steps = pl.cdiv(rows, tile_rows)          # logical blocks over rows
    steps = pl.cdiv(total_steps, num_slices)        # reduction steps per slice
    last_block = total_steps - 1                    # clamp target for OOB blocks
    needs_mask = (num_slices * steps * tile_rows) != rows

    # Free reshape (contiguous) — no padded copies of the inputs in HBM.
    p2 = predict.reshape(rows, LANE)
    t2 = target.reshape(rows, LANE)

    # Clamp keeps every DMA in-bounds even when num_slices doesn't divide the
    # logical block count; clamped blocks are fully masked in the kernel.
    in_map = lambda s, i: (jnp.minimum(s * steps + i, last_block), 0)

    kernel = partial(_multiple_loss_kernel,
                     steps_per_slice=steps, tile_rows=tile_rows,
                     rows_total=rows, needs_mask=needs_mask)

    partials = pl.pallas_call(
        kernel,
        out_shape=jax.ShapeDtypeStruct((num_slices, 2, 8, LANE), jnp.float32),
        grid=(num_slices, steps),
        in_specs=[
            pl.BlockSpec((tile_rows, LANE), in_map),
            pl.BlockSpec((tile_rows, LANE), in_map),
        ],
        out_specs=pl.BlockSpec((1, 2, 8, LANE), lambda s, i: (s, 0, 0, 0)),
        compiler_params=pltpu.CompilerParams(
            dimension_semantics=("parallel", "arbitrary"),
            vmem_limit_bytes=_VMEM_LIMIT_BYTES,
        ),
    )(p2, t2)

    # Final cross-lane / cross-slice reduction + weighting (tiny, done in XLA).
    sse = jnp.sum(partials[:, 0])
    sae = jnp.sum(partials[:, 1])
    inv_n = 1.0 / n
    return w_mse * (sse * inv_n) + w_mae * (sae * inv_n)


if __name__ == "__main__":
    key = jax.random.PRNGKey(0)
    k1, k2 = jax.random.split(key)

    def ref_loss(p, t, w=(0.5, 0.5)):
        d = p.astype(jnp.float32) - t.astype(jnp.float32)
        return w[0] * jnp.mean(d * d) + w[1] * jnp.mean(jnp.abs(d))

    checks = []

    # 1) Small NCHW, force the Pallas path (n % 128 == 0).
    shape = (2, 4, 16, 16)
    p = jax.random.normal(k1, shape, dtype=jnp.float32)
    t = jax.random.normal(k2, shape, dtype=jnp.float32)
    checks.append((multiple_loss(p, t, min_pallas_elems=0), ref_loss(p, t)))

    # 2) Row count not a multiple of the tile -> exercises in-kernel masking.
    shape2 = (1, 4, 20, 32)          # 2560 elements = 20 rows of 128
    p2 = jax.random.normal(k1, shape2, dtype=jnp.float32)
    t2 = jax.random.normal(k2, shape2, dtype=jnp.float32)
    checks.append((multiple_loss(p2, t2, min_pallas_elems=0), ref_loss(p2, t2)))

    # 3) bf16 inputs (half the HBM traffic), f32 accumulation in-kernel.
    p3 = p.astype(jnp.bfloat16)
    t3 = t.astype(jnp.bfloat16)
    checks.append((multiple_loss(p3, t3, min_pallas_elems=0), ref_loss(p3, t3)))

    # 4) Default path: tiny input uses the fused XLA fallback.
    checks.append((multiple_loss(p, t), ref_loss(p, t)))

    for got, want in checks:
        got = jax.block_until_ready(got)
        assert jnp.allclose(got, want, rtol=1e-5, atol=1e-6), (got, want)

    print("KERNEL_OK")
</pallas_src>

<mosaic_0001>
module attributes {stable_mosaic.version = 11 : i64} {
  func.func @_multiple_loss_kernel(%arg0: i32, %arg1: i32, %arg2: memref<16x128xf32, #tpu.memory_space<vmem>>, %arg3: memref<16x128xf32, #tpu.memory_space<vmem>>, %arg4: memref<1x2x8x128xf32, #tpu.memory_space<vmem>>) attributes {dimension_semantics = [#tpu.dimension_semantics<parallel>, #tpu.dimension_semantics<arbitrary>], iteration_bounds = array<i64: 1, 1>, scalar_prefetch = 0 : i64, scratch_operands = 0 : i64, tpu.core_type = #tpu.core_type<tc>, window_params = [{transform_indices = @transform_0, window_bounds = array<i64: 16, 128>}, {transform_indices = @transform_1, window_bounds = array<i64: 16, 128>}, {transform_indices = @transform_2, window_bounds = array<i64: 1, 2, 8, 128>}]} {
    %c0_i32 = arith.constant 0 : i32
    %0 = arith.cmpi eq, %arg1, %c0_i32 : i32
    %1 = arith.extui %0 : i1 to i32
    %c0_i32_0 = arith.constant 0 : i32
    %2 = arith.cmpi ne, %1, %c0_i32_0 : i32
    scf.if %2 {
      %cst_20 = arith.constant 0.000000e+00 : f32
      %24 = vector.broadcast %cst_20 : f32 to vector<1x2x8x128xf32>
      %c0_21 = arith.constant 0 : index
      %c0_22 = arith.constant 0 : index
      %c0_23 = arith.constant 0 : index
      %c0_24 = arith.constant 0 : index
      %25 = vector.load %arg4[%c0_21, %c0_22, %c0_23, %c0_24] : memref<1x2x8x128xf32, #tpu.memory_space<vmem>>, vector<1x2x8x128xf32>
      tpu.vector_store %arg4[%c0_21, %c0_22, %c0_23, %c0_24], %24 {strides = array<i32>} : memref<1x2x8x128xf32, #tpu.memory_space<vmem>>, vector<1x2x8x128xf32>,
    } else {
    }
    %c0 = arith.constant 0 : index
    %c0_1 = arith.constant 0 : index
    %3 = vector.load %arg2[%c0, %c0_1] : memref<16x128xf32, #tpu.memory_space<vmem>>, vector<16x128xf32>
    %c0_2 = arith.constant 0 : index
    %c0_3 = arith.constant 0 : index
    %4 = vector.load %arg3[%c0_2, %c0_3] : memref<16x128xf32, #tpu.memory_space<vmem>>, vector<16x128xf32>
    %5 = arith.subf %3, %4 : vector<16x128xf32>
    %6 = arith.mulf %5, %5 : vector<16x128xf32>
    %7 = math.absf %5 : vector<16x128xf32>
    %8 = vector.shape_cast %6 : vector<16x128xf32> to vector<2x8x128xf32>
    %9 = vector.shape_cast %7 : vector<16x128xf32> to vector<2x8x128xf32>
    %c0_4 = arith.constant 0 : index
    %c0_5 = arith.constant 0 : index
    %c0_6 = arith.constant 0 : index
    %c0_7 = arith.constant 0 : index
    %10 = vector.load %arg4[%c0_4, %c0_5, %c0_6, %c0_7] : memref<1x2x8x128xf32, #tpu.memory_space<vmem>>, vector<1x1x8x128xf32>
    %11 = vector.shape_cast %10 : vector<1x1x8x128xf32> to vector<8x128xf32>
    %cst = arith.constant dense<0.000000e+00> : vector<8x128xf32>
    %12 = vector.multi_reduction <add>, %8, %cst [0] : vector<2x8x128xf32> to vector<8x128xf32>
    %13 = arith.addf %11, %12 : vector<8x128xf32>
    %c0_8 = arith.constant 0 : index
    %c0_9 = arith.constant 0 : index
    %c0_10 = arith.constant 0 : index
    %c0_11 = arith.constant 0 : index
    %14 = vector.load %arg4[%c0_8, %c0_9, %c0_10, %c0_11] : memref<1x2x8x128xf32, #tpu.memory_space<vmem>>, vector<1x1x8x128xf32>
    %15 = vector.shape_cast %14 : vector<1x1x8x128xf32> to vector<8x128xf32>
    %16 = vector.shape_cast %13 : vector<8x128xf32> to vector<1x1x8x128xf32>
    tpu.vector_store %arg4[%c0_8, %c0_9, %c0_10, %c0_11], %16 {strides = array<i32>} : memref<1x2x8x128xf32, #tpu.memory_space<vmem>>, vector<1x1x8x128xf32>,
    %c0_12 = arith.constant 0 : index
    %c1 = arith.constant 1 : index
    %c0_13 = arith.constant 0 : index
    %c0_14 = arith.constant 0 : index
    %17 = vector.load %arg4[%c0_12, %c1, %c0_13, %c0_14] : memref<1x2x8x128xf32, #tpu.memory_space<vmem>>, vector<1x1x8x128xf32>
    %18 = vector.shape_cast %17 : vector<1x1x8x128xf32> to vector<8x128xf32>
    %cst_15 = arith.constant dense<0.000000e+00> : vector<8x128xf32>
    %19 = vector.multi_reduction <add>, %9, %cst_15 [0] : vector<2x8x128xf32> to vector<8x128xf32>
    %20 = arith.addf %18, %19 : vector<8x128xf32>
    %c0_16 = arith.constant 0 : index
    %c1_17 = arith.constant 1 : index
    %c0_18 = arith.constant 0 : index
    %c0_19 = arith.constant 0 : index
    %21 = vector.load %arg4[%c0_16, %c1_17, %c0_18, %c0_19] : memref<1x2x8x128xf32, #tpu.memory_space<vmem>>, vector<1x1x8x128xf32>
    %22 = vector.shape_cast %21 : vector<1x1x8x128xf32> to vector<8x128xf32>
    %23 = vector.shape_cast %20 : vector<8x128xf32> to vector<1x1x8x128xf32>
    tpu.vector_store %arg4[%c0_16, %c1_17, %c0_18, %c0_19], %23 {strides = array<i32>} : memref<1x2x8x128xf32, #tpu.memory_space<vmem>>, vector<1x1x8x128xf32>,
    return
  }
  func.func @transform_0(%arg0: i32, %arg1: i32) -> (i32, i32) {
    %c1_i32 = arith.constant 1 : i32
    %0 = arith.muli %arg0, %c1_i32 : i32
    %1 = arith.addi %0, %arg1 : i32
    %c0_i32 = arith.constant 0 : i32
    %2 = arith.minsi %1, %c0_i32 : i32
    %c0_i32_0 = arith.constant 0 : i32
    %c0_i32_1 = arith.constant 0 : i32
    return %2, %c0_i32_0 : i32, i32
  }
  func.func @transform_1(%arg0: i32, %arg1: i32) -> (i32, i32) {
    %c1_i32 = arith.constant 1 : i32
    %0 = arith.muli %arg0, %c1_i32 : i32
    %1 = arith.addi %0, %arg1 : i32
    %c0_i32 = arith.constant 0 : i32
    %2 = arith.minsi %1, %c0_i32 : i32
    %c0_i32_0 = arith.constant 0 : i32
    %c0_i32_1 = arith.constant 0 : i32
    return %2, %c0_i32_0 : i32, i32
  }
  func.func @transform_2(%arg0: i32, %arg1: i32) -> (i32, i32, i32, i32) {
    %c0_i32 = arith.constant 0 : i32
    %c0_i32_0 = arith.constant 0 : i32
    %c0_i32_1 = arith.constant 0 : i32
    %c0_i32_2 = arith.constant 0 : i32
    return %arg0, %c0_i32, %c0_i32_0, %c0_i32_1 : i32, i32, i32, i32
  }
}

</mosaic_0001>

<bundles_post_ra>
// kernel: tpu_custom_call.1
= control target key start
LH: loop header
LB: loop body
LE: loop exit
PB: predicated region body
PF: predicated region fallthrough
CT: control target
= control target key end

     0   :  { %7 = vsyncpa [#allocation3], 0  ;;  %s250_s0 = inlined_call_operand.hbm [shape: f32[16,128], index: 0, kind: input, shape index: {}]   ;;  %s251_s1 = inlined_call_operand.hbm [shape: f32[16,128], index: 1, kind: input, shape index: {}]   ;;  %s252_s2 = inlined_call_operand.hbm [shape: f32[1,2,8,128], index: 2, kind: output, shape index: {}]  }
   0x1   :  { %8 = vsyncpa [#allocation6], 0 }
   0x2   :  { %9 = vsyncpa [#allocation4], 0  ;;  %s185_s9 = smov [#allocation2]   ;;  %s113_s13 = scalar_lea.hbm %s250_s0, 256 }
   0x3   :  { %s21_s10 = sshll.u32 %s185_s9, 4  ;;  %p114_p0 = scmp.ne.s32.totalorder %s250_s0, %s113_s13  ;;  %s22_s10 = int_to_ptr.vmem [resolvable:$true] %s21_s10 }
   0x4   :  { %p117_p1 = scmp.lt.u32.totalorder %s113_s13, %s250_s0 }
   0x6   :  { %p119_p2 = pnand %p117_p1, %p114_p0 }
   0x8   :  { %122 = shalt.err (!%p119_p2)
}
   0x9   :  { %s123_s18 = scalar_lea.vmem %s22_s10, 256  ;;  %p128_p4 = scmp.lt.s32.totalorder %s22_s10, %s22_s10 }
   0xa   :  { %p124_p3 = scmp.ne.s32.totalorder %s22_s10, %s123_s18  ;;  %p129_p5 = scmp.lt.s32.totalorder %s123_s18, %s123_s18 }
   0xc   :  { %p130_p6 = por %p129_p5, %p128_p4 }
   0xe   :  { %p131_p7 = pnand %p130_p6, %p124_p3 }
  0x10   :  { %134 = shalt.err (!%p131_p7)
}
  0x11   :  { %s186_s19 = smov 128   ;;  %s187_s20 = smov 8  }
  0x12   :  { %27 = dma.hbm_to_vmem [thread:$0]  %s250_s0, 256, %s22_s10, [#allocation3], %s186_s19, %s186_s19, %s187_s20  }
  0x13   :  { %s188_s23 = smov [#allocation5]   ;;  %s135_s27 = scalar_lea.hbm %s251_s1, 256 }
  0x14   :  { %s39_s24 = sshll.u32 %s188_s23, 4  ;;  %p136_p8 = scmp.ne.s32.totalorder %s251_s1, %s135_s27  ;;  %s40_s24 = int_to_ptr.vmem [resolvable:$true] %s39_s24 }
  0x15   :  { %p139_p9 = scmp.lt.u32.totalorder %s135_s27, %s251_s1 }
  0x17   :  { %p141_p10 = pnand %p139_p9, %p136_p8 }
  0x19   :  { %144 = shalt.err (!%p141_p10)
}
  0x1a   :  { %s145_s4 = scalar_lea.vmem %s40_s24, 256  ;;  %p150_p12 = scmp.lt.s32.totalorder %s40_s24, %s40_s24 }
  0x1b   :  { %p146_p11 = scmp.ne.s32.totalorder %s40_s24, %s145_s4  ;;  %p151_p13 = scmp.lt.s32.totalorder %s145_s4, %s145_s4 }
  0x1d   :  { %p152_p0 = por %p151_p13, %p150_p12 }
  0x1f   :  { %p153_p1 = pnand %p152_p0, %p146_p11 }
  0x21   :  { %156 = shalt.err (!%p153_p1)
}
  0x22   :  { %45 = dma.hbm_to_vmem [thread:$0]  %s251_s1, 256, %s40_s24, [#allocation6], %s186_s19, %s186_s19, %s187_s20  }
  0x23   :  { %179 = dma.done.wait [#allocation3], 256  }
  0x24   :  { %180 = vsyncadd [#allocation3], 4294967040 }
  0x25   :  { %181 = dma.done.wait [#allocation6], 256  }
  0x26   :  { %182 = vsyncadd [#allocation6], 4294967040  ;;  %v66_v0 = vld [vmem:[#allocation2] sm:$0xff]  ;;  %v67_v1 = vld [vmem:[#allocation2 + $0x8] sm:$0xff]  ;;  %s189_s6 = smov [#allocation7]  }
  0x27   :  { %v68_v2 = vld [vmem:[#allocation5] sm:$0xff]  ;;  %v69_v3 = vld [vmem:[#allocation5 + $0x8] sm:$0xff]  ;;  %s90_s7 = sshll.u32 %s189_s6, 4  ;;  %s91_s7 = int_to_ptr.vmem [resolvable:$true] %s90_s7 }
  0x28   :  { %v70_v4 = vsub.f32 %v66_v0, %v68_v2  ;;  %v71_v5 = vsub.f32 %v67_v1, %v69_v3  ;;  %s157_s1 = scalar_lea.vmem %s91_s7, 256  ;;  %p162_p3 = scmp.lt.s32.totalorder %s91_s7, %s91_s7 }
  0x29   :  { %p158_p2 = scmp.ne.s32.totalorder %s91_s7, %s157_s1  ;;  %p163_p4 = scmp.lt.s32.totalorder %s157_s1, %s157_s1 }
  0x2a   :  { %v72_v6 = vmul.f32 %v70_v4, %v70_v4  ;;  %v74_v7 = vand.u32 2147483647, %v70_v4  ;;  %v73_v8 = vmul.f32 %v71_v5, %v71_v5  ;;  %v75_v9 = vand.u32 2147483647, %v71_v5 }
  0x2b   :  { %p164_p5 = por %p163_p4, %p162_p3 }
  0x2c   :  { %v77_v10 = vadd.f32 %v73_v8, %v72_v6  ;;  %v82_v11 = vadd.f32 %v75_v9, %v74_v7 }
  0x2d   :  { %p165_p6 = pnand %p164_p5, %p158_p2 }
  0x2e   :  { %79 = vst [vmem:[#allocation7] sm:$0xff] %v77_v10  ;;  %84 = vst [vmem:[#allocation7 + $0x8] sm:$0xff] %v82_v11 }
  0x2f   :  { %168 = shalt.err (!%p165_p6)
}
  0x30   :  { %s169_s10 = scalar_lea.hbm %s252_s2, 256 }
  0x31   :  { %p170_p7 = scmp.ne.s32.totalorder %s252_s2, %s169_s10  ;;  %p173_p8 = scmp.lt.u32.totalorder %s169_s10, %s252_s2 }
  0x33   :  { %p175_p9 = pnand %p173_p8, %p170_p7 }
  0x35   :  { %178 = shalt.err (!%p175_p9)
}
  0x36   :  { %96 = dma.vmem_to_hbm [thread:$0]  %s91_s7, 256, %s252_s2, [#allocation4], %s186_s19, %s186_s19, %s187_s20  }
  0x37   :  { %183 = dma.done.wait [#allocation4], 256  }
  0x38   :  { %184 = vsyncadd [#allocation4], 4294967040 }
  0x39   :  { %100 = vsyncpa [#allocation3], 1 }
  0x3a   :  { %101 = vsyncpa [#allocation6], 1 }
  0x3b   :  { %102 = vsyncpa [#allocation4], 1 }

</bundles_post_ra>
